<compile_context>
chip_gen: v7x
topology: tpu7x:2x2x1
jax: 0.10.0
libtpu: 0.0.40
codegen_flags: <defaults>
</compile_context>

<pallas_src>
import functools
import math

import numpy as np
import jax
import jax.numpy as jnp
from jax import lax
from jax.experimental import pallas as pl
from jax.experimental.pallas import tpu as pltpu

_EPS = 1e-5                       # torch GroupNorm default eps
_INV_SQRT2 = 1.0 / math.sqrt(2.0)


def _default_vmem_limit():
    """Generation-aware scoped-VMEM budget: ~3/4 of physical (48 MiB v7x, 96 MiB v5e/v6e)."""
    try:
        cap = int(getattr(pltpu.get_tpu_info(), "vmem_capacity_bytes", 0) or 0)
        if cap > 0:
            return (3 * cap) // 4
    except Exception:
        pass
    return 48 * 1024 * 1024


_VMEM_LIMIT = _default_vmem_limit()


def _gelu(x):
    # exact (erf-based) GELU, matching torch.nn.GELU() default
    return 0.5 * x * (1.0 + lax.erf(x * _INV_SQRT2))


def _gn_affine_gelu(acc, gdown_scaled, gup, gamma, beta):
    """GroupNorm over all rows of `acc` and the channels of each group, then affine + GELU.

    acc:          (M, C) float32 conv output for one sample
    gdown_scaled: (C, G) group aggregation matrix with 1/(M * C_per_group) folded in
    gup:          (G, C) broadcast-back matrix (0/1)
    """
    csum = jnp.sum(acc, axis=0, keepdims=True)                                    # (1, C)
    mean = jnp.dot(jnp.dot(csum, gdown_scaled, preferred_element_type=jnp.float32),
                   gup, preferred_element_type=jnp.float32)                       # (1, C)
    cent = acc - mean
    csq = jnp.sum(cent * cent, axis=0, keepdims=True)                             # (1, C)
    var = jnp.dot(jnp.dot(csq, gdown_scaled, preferred_element_type=jnp.float32),
                  gup, preferred_element_type=jnp.float32)                        # (1, C)
    y = cent * lax.rsqrt(var + _EPS)
    return _gelu(y * gamma + beta)


def _group_agg_mats(C, groups, n_rows):
    cg = C // groups
    gd = (np.arange(C)[:, None] // cg == np.arange(groups)[None, :]).astype(np.float32)
    gd_scaled = gd / float(n_rows * cg)        # fold the 1/N of the GroupNorm mean into gdown
    return jnp.asarray(gd_scaled), jnp.asarray(np.ascontiguousarray(gd.T))


def _zero_halo_3d(pad_ref, H, W, ph, pw):
    """Zero only the halo border of a (H+2ph, W+2pw, C) pad scratch (interior rewritten)."""
    Hp, Wp, C = pad_ref.shape
    if ph:
        zr = jnp.zeros((ph, Wp, C), pad_ref.dtype)
        pad_ref[0:ph, :, :] = zr
        pad_ref[ph + H:Hp, :, :] = zr
    if pw:
        zc = jnp.zeros((Hp, pw, C), pad_ref.dtype)
        pad_ref[:, 0:pw, :] = zc
        pad_ref[:, pw + W:Wp, :] = zc


def _zero_halo_4d(pad_ref, H, W, ph, pw):
    """Zero only the spatial halo border of a (T, H+2ph, W+2pw, C) pad scratch."""
    T, Hp, Wp, C = pad_ref.shape
    if ph:
        zr = jnp.zeros((T, ph, Wp, C), pad_ref.dtype)
        pad_ref[:, 0:ph, :, :] = zr
        pad_ref[:, ph + H:Hp, :, :] = zr
    if pw:
        zc = jnp.zeros((T, Hp, pw, C), pad_ref.dtype)
        pad_ref[:, :, 0:pw, :] = zc
        pad_ref[:, :, pw + W:Wp, :] = zc


# ---------------------------------------------------------------------------
# Kernel 1: fused spatial ResBlock
#   conv1(3x3,no-bias)+GN+GELU+emb  ->  conv2(3x3,no-bias)+GN+GELU  ->  + res_conv(1x1)(x)
# ---------------------------------------------------------------------------
def _spatial_resblock_kernel(x_ref, w1_ref, w2_ref,
                             gd1_ref, gu1_ref, g1_ref, b1_ref,
                             gd2_ref, gu2_ref, g2_ref, b2_ref,
                             emb_ref, rw_ref, rb_ref,
                             o_ref, xpad_ref, hpad_ref, *, kh, kw):
    _, H, W, Cout = o_ref.shape
    Cin = x_ref.shape[-1]
    Cmid = hpad_ref.shape[-1]
    ph, pw = kh // 2, kw // 2
    HW = H * W

    # refresh the zero halo (border only; interior is fully overwritten below)
    _zero_halo_3d(xpad_ref, H, W, ph, pw)
    _zero_halo_3d(hpad_ref, H, W, ph, pw)
    xpad_ref[ph:ph + H, pw:pw + W, :] = x_ref[0]

    # ---- conv1: kh partial-K matmuls, K = kw*Cin, f32 accumulation ----
    acc = None
    for i in range(kh):
        taps = [xpad_ref[i:i + H, j:j + W, :].reshape(HW, Cin) for j in range(kw)]
        patch = jnp.concatenate(taps, axis=-1)                         # (HW, kw*Cin)
        wslab = w1_ref[i * kw * Cin:(i + 1) * kw * Cin, :]
        part = jnp.dot(patch, wslab, preferred_element_type=jnp.float32)
        acc = part if acc is None else acc + part

    h = _gn_affine_gelu(acc, gd1_ref[...], gu1_ref[...], g1_ref[...], b1_ref[...])
    h = h + emb_ref[0]                                   # (1, Cmid) broadcast over rows
    hpad_ref[ph:ph + H, pw:pw + W, :] = h.reshape(H, W, Cmid).astype(hpad_ref.dtype)

    # ---- conv2: kh partial-K matmuls, K = kw*Cmid ----
    acc2 = None
    for i in range(kh):
        taps = [hpad_ref[i:i + H, j:j + W, :].reshape(HW, Cmid) for j in range(kw)]
        patch = jnp.concatenate(taps, axis=-1)                         # (HW, kw*Cmid)
        wslab = w2_ref[i * kw * Cmid:(i + 1) * kw * Cmid, :]
        part = jnp.dot(patch, wslab, preferred_element_type=jnp.float32)
        acc2 = part if acc2 is None else acc2 + part

    y = _gn_affine_gelu(acc2, gd2_ref[...], gu2_ref[...], g2_ref[...], b2_ref[...])
    # fused 1x1 res_conv (with bias) on the original block input
    res = jnp.dot(x_ref[0].reshape(HW, Cin), rw_ref[...],
                  preferred_element_type=jnp.float32) + rb_ref[...]
    o_ref[...] = (y + res).reshape(1, H, W, Cout).astype(o_ref.dtype)


def spatial_resblock(x, conv1_w, gn1_g, gn1_b, conv2_w, gn2_g, gn2_b,
                     emb, res_w, res_b, groups=8):
    N, H, W, Cin = x.shape
    KH, KW, _, Cmid = conv1_w.shape
    Cout = conv2_w.shape[-1]
    ph, pw = KH // 2, KW // 2
    HW = H * W
    w1 = conv1_w.reshape(KH * KW * Cin, Cmid).astype(jnp.bfloat16)
    w2 = conv2_w.reshape(KH * KW * Cmid, Cout).astype(jnp.bfloat16)
    rw = res_w.astype(jnp.bfloat16)
    gd1, gu1 = _group_agg_mats(Cmid, groups, HW)
    gd2, gu2 = _group_agg_mats(Cout, groups, HW)
    emb3 = emb.reshape(N, 1, Cmid)
    kernel = functools.partial(_spatial_resblock_kernel, kh=KH, kw=KW)
    return pl.pallas_call(
        kernel,
        out_shape=jax.ShapeDtypeStruct((N, H, W, Cout), jnp.bfloat16),
        grid=(N,),
        in_specs=[
            pl.BlockSpec((1, H, W, Cin), lambda i: (i, 0, 0, 0)),
            pl.BlockSpec(w1.shape, lambda i: (0, 0)),
            pl.BlockSpec(w2.shape, lambda i: (0, 0)),
            pl.BlockSpec(gd1.shape, lambda i: (0, 0)),
            pl.BlockSpec(gu1.shape, lambda i: (0, 0)),
            pl.BlockSpec((1, Cmid), lambda i: (0, 0)),
            pl.BlockSpec((1, Cmid), lambda i: (0, 0)),
            pl.BlockSpec(gd2.shape, lambda i: (0, 0)),
            pl.BlockSpec(gu2.shape, lambda i: (0, 0)),
            pl.BlockSpec((1, Cout), lambda i: (0, 0)),
            pl.BlockSpec((1, Cout), lambda i: (0, 0)),
            pl.BlockSpec((1, 1, Cmid), lambda i: (i, 0, 0)),
            pl.BlockSpec((Cin, Cout), lambda i: (0, 0)),
            pl.BlockSpec((1, Cout), lambda i: (0, 0)),
        ],
        out_specs=pl.BlockSpec((1, H, W, Cout), lambda i: (i, 0, 0, 0)),
        scratch_shapes=[
            pltpu.VMEM((H + 2 * ph, W + 2 * pw, Cin), jnp.bfloat16),
            pltpu.VMEM((H + 2 * ph, W + 2 * pw, Cmid), jnp.bfloat16),
        ],
        compiler_params=pltpu.CompilerParams(
            dimension_semantics=("parallel",), vmem_limit_bytes=_VMEM_LIMIT),
    )(x, w1, w2, gd1, gu1, gn1_g, gn1_b, gd2, gu2, gn2_g, gn2_b, emb3, rw, res_b)


# ---------------------------------------------------------------------------
# Kernel 2: fused temporal ResBlock (time_stack) + AlphaBlender
#   tconv1(3x3x3)+GN+GELU+t-emb -> tconv2(3x3x3)+GN+GELU -> identity skip
#   blend: out = alpha*s + (1-alpha)*(s + y) = s + (1-alpha)*y
# ---------------------------------------------------------------------------
def _temporal_resblock_blend_kernel(s_ref, w1_ref, w2_ref,
                                    gd_ref, gu_ref, g1_ref, b1_ref, g2_ref, b2_ref,
                                    emb_ref, oma_ref,
                                    o_ref, spad_ref, hpad_ref, acc_ref,
                                    *, kt, kh, kw):
    _, T, H, W, C = o_ref.shape
    pt, ph, pw = kt // 2, kh // 2, kw // 2
    HW = H * W
    ktap = kh * kw * C        # K of each partial (single temporal tap) matmul

    # refresh the zero spatial halos (border only); T padding handled by skipping taps
    _zero_halo_4d(spad_ref, H, W, ph, pw)
    _zero_halo_4d(hpad_ref, H, W, ph, pw)
    spad_ref[:, ph:ph + H, pw:pw + W, :] = s_ref[0]

    def conv3d(inpad_ref, w_ref):
        # per output frame: partial-K accumulation over valid temporal taps;
        # out-of-range source frames contribute zero and are simply skipped.
        for t in range(T):
            acc_t = None
            for a in range(kt):
                src = t + a - pt
                if src < 0 or src >= T:
                    continue
                taps = [inpad_ref[src, i:i + H, j:j + W, :].reshape(HW, C)
                        for i in range(kh) for j in range(kw)]
                patch = jnp.concatenate(taps, axis=-1)                 # (HW, kh*kw*C)
                wslab = w_ref[a * ktap:(a + 1) * ktap, :]
                part = jnp.dot(patch, wslab, preferred_element_type=jnp.float32)
                acc_t = part if acc_t is None else acc_t + part
            acc_ref[t * HW:(t + 1) * HW, :] = acc_t

    # ---- tconv1 + GN + GELU + per-frame emb ----
    conv3d(spad_ref, w1_ref)
    h = _gn_affine_gelu(acc_ref[...], gd_ref[...], gu_ref[...], g1_ref[...], b1_ref[...])
    h = h.reshape(T, HW, C) + emb_ref[0][:, None, :]     # per-(t, c) emb broadcast over (h, w)
    hpad_ref[:, ph:ph + H, pw:pw + W, :] = h.reshape(T, H, W, C).astype(hpad_ref.dtype)

    # ---- tconv2 + GN + GELU (acc scratch reused) ----
    conv3d(hpad_ref, w2_ref)
    y = _gn_affine_gelu(acc_ref[...], gd_ref[...], gu_ref[...], g2_ref[...], b2_ref[...])

    # ---- identity skip + AlphaBlender, vectorized single store ----
    oma = oma_ref[0].reshape(T, 1, 1, 1)                 # (1 - alpha) per frame
    out = s_ref[0].astype(jnp.float32) + oma * y.reshape(T, H, W, C)
    o_ref[0] = out.astype(o_ref.dtype)


def temporal_resblock_blend(s, conv1_w, gn1_g, gn1_b, conv2_w, gn2_g, gn2_b,
                            emb_t, one_minus_alpha, groups=8):
    B, T, H, W, C = s.shape
    KT, KH, KW, _, _ = conv1_w.shape
    ph, pw = KH // 2, KW // 2
    M = T * H * W
    w1 = conv1_w.reshape(KT * KH * KW * C, C).astype(jnp.bfloat16)
    w2 = conv2_w.reshape(KT * KH * KW * C, C).astype(jnp.bfloat16)
    gd, gu = _group_agg_mats(C, groups, M)
    oma = one_minus_alpha.reshape(B, T, 1, 1).astype(jnp.float32)
    kernel = functools.partial(_temporal_resblock_blend_kernel, kt=KT, kh=KH, kw=KW)
    return pl.pallas_call(
        kernel,
        out_shape=jax.ShapeDtypeStruct((B, T, H, W, C), jnp.bfloat16),
        grid=(B,),
        in_specs=[
            pl.BlockSpec((1, T, H, W, C), lambda i: (i, 0, 0, 0, 0)),
            pl.BlockSpec(w1.shape, lambda i: (0, 0)),
            pl.BlockSpec(w2.shape, lambda i: (0, 0)),
            pl.BlockSpec(gd.shape, lambda i: (0, 0)),
            pl.BlockSpec(gu.shape, lambda i: (0, 0)),
            pl.BlockSpec((1, C), lambda i: (0, 0)),
            pl.BlockSpec((1, C), lambda i: (0, 0)),
            pl.BlockSpec((1, C), lambda i: (0, 0)),
            pl.BlockSpec((1, C), lambda i: (0, 0)),
            pl.BlockSpec((1, T, C), lambda i: (i, 0, 0)),
            pl.BlockSpec((1, T, 1, 1), lambda i: (i, 0, 0, 0)),
        ],
        out_specs=pl.BlockSpec((1, T, H, W, C), lambda i: (i, 0, 0, 0, 0)),
        scratch_shapes=[
            pltpu.VMEM((T, H + 2 * ph, W + 2 * pw, C), jnp.bfloat16),   # padded conv1 input
            pltpu.VMEM((T, H + 2 * ph, W + 2 * pw, C), jnp.bfloat16),   # padded conv2 input
            pltpu.VMEM((M, C), jnp.float32),                            # f32 conv accumulator
        ],
        compiler_params=pltpu.CompilerParams(
            dimension_semantics=("parallel",), vmem_limit_bytes=_VMEM_LIMIT),
    )(s, w1, w2, gd, gu, gn1_g, gn1_b, gn2_g, gn2_b, emb_t, oma)


# ---------------------------------------------------------------------------
# emb_layer: Linear -> SiLU -> Linear (tiny, single pallas_call)
# ---------------------------------------------------------------------------
def _mlp_kernel(t_ref, w1_ref, b1_ref, w2_ref, b2_ref, o_ref):
    h = jnp.dot(t_ref[...], w1_ref[...], preferred_element_type=jnp.float32) + b1_ref[...]
    h = h * jax.nn.sigmoid(h)  # SiLU
    o_ref[...] = jnp.dot(h, w2_ref[...], preferred_element_type=jnp.float32) + b2_ref[...]


def mlp_silu_mlp(t, w1, b1, w2, b2):
    N = t.shape[0]
    Cout = w2.shape[1]
    return pl.pallas_call(
        _mlp_kernel,
        out_shape=jax.ShapeDtypeStruct((N, Cout), jnp.float32),
        compiler_params=pltpu.CompilerParams(vmem_limit_bytes=_VMEM_LIMIT),
    )(t, w1, b1, w2, b2)


# ---------------------------------------------------------------------------
# Parameters & forward pass
# ---------------------------------------------------------------------------
def init_params(key, cin, cout, cmid, pos):
    ks = jax.random.split(key, 16)

    def w(k, shape, scale=0.1):
        return scale * jax.random.normal(k, shape, jnp.float32)

    p = {}
    # spatial ResBlock (dims=2), kernel 3, mid_channels = out_channels
    p['conv1_w'] = w(ks[0], (3, 3, cin, cmid))
    p['gn1_g'] = jnp.ones((1, cmid), jnp.float32)
    p['gn1_b'] = jnp.zeros((1, cmid), jnp.float32)
    p['conv2_w'] = w(ks[1], (3, 3, cmid, cout))
    p['gn2_g'] = jnp.ones((1, cout), jnp.float32)
    p['gn2_b'] = jnp.zeros((1, cout), jnp.float32)
    p['res_w'] = w(ks[2], (cin, cout))          # res_conv 1x1 (in != out)
    p['res_b'] = w(ks[3], (1, cout))
    p['emb_w1'] = w(ks[4], (pos, pos))
    p['emb_b1'] = w(ks[5], (1, pos))
    p['emb_w2'] = w(ks[6], (pos, cmid))
    p['emb_b2'] = w(ks[7], (1, cmid))
    # temporal ResBlock (time_stack, dims=3), in = out = mid = cout, kernel 3
    p['tconv1_w'] = w(ks[8], (3, 3, 3, cout, cout))
    p['tgn1_g'] = jnp.ones((1, cout), jnp.float32)
    p['tgn1_b'] = jnp.zeros((1, cout), jnp.float32)
    p['tconv2_w'] = w(ks[9], (3, 3, 3, cout, cout))
    p['tgn2_g'] = jnp.ones((1, cout), jnp.float32)
    p['tgn2_b'] = jnp.zeros((1, cout), jnp.float32)
    p['t_emb_w1'] = w(ks[10], (pos, pos))
    p['t_emb_b1'] = w(ks[11], (1, pos))
    p['t_emb_w2'] = w(ks[12], (pos, cout))
    p['t_emb_b2'] = w(ks[13], (1, cout))
    # AlphaBlender (merge_strategy='learned_with_images'), merge_factor = 0.5
    p['mix_factor'] = jnp.asarray(0.5, jnp.float32)
    return p


def video_res_block_forward(params, x, timesteps, num_video_frames,
                            image_only_indicator, groups=8):
    p = params
    BT, H, W, _ = x.shape
    T = num_video_frames
    B = BT // T
    Cout = p['conv2_w'].shape[-1]

    x_bf = x.astype(jnp.bfloat16)

    # ---- spatial ResBlock (dims=2) over the merged (b t) batch ----
    emb = mlp_silu_mlp(timesteps, p['emb_w1'], p['emb_b1'], p['emb_w2'], p['emb_b2'])  # (BT, Cmid)
    s = spatial_resblock(x_bf, p['conv1_w'], p['gn1_g'], p['gn1_b'],
                         p['conv2_w'], p['gn2_g'], p['gn2_b'],
                         emb, p['res_w'], p['res_b'], groups)          # (BT, H, W, Cout) bf16

    # rearrange '(b t) c h w -> b c t h w' is a pure reshape in channels-last layout
    s5 = s.reshape(B, T, H, W, Cout)

    # ---- temporal ResBlock (time_stack, dims=3; res_conv = Identity) + AlphaBlender ----
    emb_t = mlp_silu_mlp(timesteps, p['t_emb_w1'], p['t_emb_b1'],
                         p['t_emb_w2'], p['t_emb_b2']).reshape(B, T, Cout)
    # AlphaBlender ('learned_with_images', 'b t -> b 1 t 1 1'):
    #   out = alpha*s + (1-alpha)*(s + y) = s + (1-alpha)*y   (fused into kernel 2 epilogue)
    alpha = jnp.where(image_only_indicator.astype(bool),
                      jnp.float32(1.0),
                      jax.nn.sigmoid(p['mix_factor'])).astype(jnp.float32)   # (B, T)
    out5 = temporal_resblock_blend(s5, p['tconv1_w'], p['tgn1_g'], p['tgn1_b'],
                                   p['tconv2_w'], p['tgn2_g'], p['tgn2_b'],
                                   emb_t, 1.0 - alpha, groups)               # (B,T,H,W,C) bf16

    # rearrange 'b c t h w -> (b t) c h w' is a pure reshape here; output kept bf16
    # (cast outside if the caller needs f32).
    return out5.reshape(BT, H, W, Cout)


if __name__ == "__main__":
    B, T, H, W = 2, 4, 16, 16
    Cin, Cout, Cmid, POS = 8, 32, 32, 32      # mid_channels=None -> mid = out
    GROUPS = 8

    key = jax.random.PRNGKey(0)
    kx, kt, kp = jax.random.split(key, 3)
    x = jax.random.normal(kx, (B * T, H, W, Cin), jnp.float32)          # NHWC
    timesteps = jax.random.normal(kt, (B * T, POS), jnp.float32)
    image_only_indicator = jnp.array([[0., 0., 1., 0.],
                                      [1., 0., 0., 0.]], jnp.float32)   # (B, T)
    params = init_params(kp, Cin, Cout, Cmid, POS)

    out = video_res_block_forward(params, x, timesteps, T, image_only_indicator, GROUPS)
    jax.block_until_ready(out)
    assert out.shape == (B * T, H, W, Cout)
    assert bool(jnp.all(jnp.isfinite(out)))
    print("KERNEL_OK")
</pallas_src>

<mosaic_0001>
module attributes {stable_mosaic.version = 11 : i64} {
  func.func @_mlp_kernel(%arg0: memref<8x32xf32, #tpu.memory_space<vmem>>, %arg1: memref<32x32xf32, #tpu.memory_space<vmem>>, %arg2: memref<1x32xf32, #tpu.memory_space<vmem>>, %arg3: memref<32x32xf32, #tpu.memory_space<vmem>>, %arg4: memref<1x32xf32, #tpu.memory_space<vmem>>, %arg5: memref<8x32xf32, #tpu.memory_space<vmem>>) attributes {dimension_semantics = [], scalar_prefetch = 0 : i64, scratch_operands = 0 : i64, tpu.core_type = #tpu.core_type<tc>} {
    %c0 = arith.constant 0 : index
    %c0_0 = arith.constant 0 : index
    %0 = vector.load %arg0[%c0, %c0_0] : memref<8x32xf32, #tpu.memory_space<vmem>>, vector<8x32xf32>
    %c0_1 = arith.constant 0 : index
    %c0_2 = arith.constant 0 : index
    %1 = vector.load %arg1[%c0_1, %c0_2] : memref<32x32xf32, #tpu.memory_space<vmem>>, vector<32x32xf32>
    %cst = arith.constant dense<0.000000e+00> : vector<8x32xf32>
    %2 = tpu.matmul %0, %1, %cst {dimension_numbers = #tpu.dot_dimension_numbers<[1], [0], [0], [1], [0, 0, 1, 1], [], []>} : vector<8x32xf32>, vector<32x32xf32>, vector<8x32xf32> -> vector<8x32xf32>
    %c0_3 = arith.constant 0 : index
    %c0_4 = arith.constant 0 : index
    %3 = vector.load %arg2[%c0_3, %c0_4] : memref<1x32xf32, #tpu.memory_space<vmem>>, vector<1x32xf32>
    %4 = vector.broadcast %3 : vector<1x32xf32> to vector<8x32xf32>
    %5 = arith.addf %2, %4 : vector<8x32xf32>
    %6 = arith.negf %5 : vector<8x32xf32>
    %7 = math.exp %6 : vector<8x32xf32>
    %cst_5 = arith.constant 1.000000e+00 : f32
    %8 = vector.broadcast %cst_5 : f32 to vector<8x32xf32>
    %9 = arith.addf %8, %7 : vector<8x32xf32>
    %10 = arith.divf %8, %9 : vector<8x32xf32>
    %11 = arith.mulf %5, %10 : vector<8x32xf32>
    %c0_6 = arith.constant 0 : index
    %c0_7 = arith.constant 0 : index
    %12 = vector.load %arg3[%c0_6, %c0_7] : memref<32x32xf32, #tpu.memory_space<vmem>>, vector<32x32xf32>
    %cst_8 = arith.constant dense<0.000000e+00> : vector<8x32xf32>
    %13 = tpu.matmul %11, %12, %cst_8 {dimension_numbers = #tpu.dot_dimension_numbers<[1], [0], [0], [1], [0, 0, 1, 1], [], []>} : vector<8x32xf32>, vector<32x32xf32>, vector<8x32xf32> -> vector<8x32xf32>
    %c0_9 = arith.constant 0 : index
    %c0_10 = arith.constant 0 : index
    %14 = vector.load %arg4[%c0_9, %c0_10] : memref<1x32xf32, #tpu.memory_space<vmem>>, vector<1x32xf32>
    %15 = vector.broadcast %14 : vector<1x32xf32> to vector<8x32xf32>
    %16 = arith.addf %13, %15 : vector<8x32xf32>
    %c0_11 = arith.constant 0 : index
    %c0_12 = arith.constant 0 : index
    %17 = vector.load %arg5[%c0_11, %c0_12] : memref<8x32xf32, #tpu.memory_space<vmem>>, vector<8x32xf32>
    tpu.vector_store %arg5[%c0_11, %c0_12], %16 {strides = array<i32>} : memref<8x32xf32, #tpu.memory_space<vmem>>, vector<8x32xf32>,
    return
  }
}

</mosaic_0001>

<bundles_post_ra>
// kernel: tpu_custom_call.1
= control target key start
LH: loop header
LB: loop body
LE: loop exit
PB: predicated region body
PF: predicated region fallthrough
CT: control target
= control target key end

     0   :  { %10 = vsyncpa [#allocation3], 0  ;;  %s512_s0 = inlined_call_operand.hbm [shape: f32[8,32], index: 0, kind: input, shape index: {}]   ;;  %s513_s1 = inlined_call_operand.hbm [shape: f32[32,32], index: 1, kind: input, shape index: {}]   ;;  %s514_s2 = inlined_call_operand.vmem [shape: f32[1,32], index: 2, kind: input, shape index: {}]   ;;  %s515_s3 = inlined_call_operand.hbm [shape: f32[32,32], index: 3, kind: input, shape index: {}]   ;;  %s516_s4 = inlined_call_operand.vmem [shape: f32[1,32], index: 4, kind: input, shape index: {}]   ;;  %s517_s5 = inlined_call_operand.hbm [shape: f32[8,32], index: 5, kind: output, shape index: {}]  }
   0x1   :  { %11 = vsyncpa [#allocation6], 0 }
   0x2   :  { %12 = vsyncpa [#allocation4], 0  ;;  %s410_s18 = smov [#allocation5]   ;;  %s316_s22 = scalar_lea.hbm %s513_s1, 512 }
   0x3   :  { %s28_s19 = sshll.u32 %s410_s18, 4  ;;  %p317_p0 = scmp.ne.s32.totalorder %s513_s1, %s316_s22  ;;  %s29_s19 = int_to_ptr.vmem [resolvable:$true] %s28_s19 }
   0x4   :  { %p320_p1 = scmp.lt.u32.totalorder %s316_s22, %s513_s1 }
   0x6   :  { %p322_p2 = pnand %p320_p1, %p317_p0 }
   0x8   :  { %325 = shalt.err (!%p322_p2)
}
   0x9   :  { %s326_s27 = scalar_lea.vmem %s29_s19, 512  ;;  %p331_p4 = scmp.lt.s32.totalorder %s29_s19, %s29_s19 }
   0xa   :  { %p327_p3 = scmp.ne.s32.totalorder %s29_s19, %s326_s27  ;;  %p332_p5 = scmp.lt.s32.totalorder %s326_s27, %s326_s27 }
   0xc   :  { %p333_p6 = por %p332_p5, %p331_p4 }
   0xe   :  { %p334_p7 = pnand %p333_p6, %p327_p3 }
  0x10   :  { %337 = shalt.err (!%p334_p7)
}
  0x11   :  { %s411_s28 = smov 128   ;;  %s412_s29 = smov 8  }
  0x12   :  { %34 = dma.hbm_to_vmem [thread:$0]  %s513_s1, 512, %s29_s19, [#allocation6], %s411_s28, %s411_s28, %s412_s29  }
  0x13   :  { %s413_s7 = smov [#allocation2]   ;;  %s414_s9 = smov [#allocation7]  }
  0x14   :  { %s19_s8 = sshll.u32 %s413_s7, 4  ;;  %s42_s10 = sshll.u32 %s414_s9, 4  ;;  %s20_s8 = int_to_ptr.vmem [resolvable:$true] %s19_s8  ;;  %s43_s10 = int_to_ptr.vmem [resolvable:$true] %s42_s10 }
  0x15   :  { %s338_s13 = scalar_lea.hbm %s512_s0, 128 }
  0x16   :  { %p339_p8 = scmp.ne.s32.totalorder %s512_s0, %s338_s13  ;;  %p342_p9 = scmp.lt.u32.totalorder %s338_s13, %s512_s0 }
  0x18   :  { %p344_p10 = pnand %p342_p9, %p339_p8 }
  0x1a   :  { %347 = shalt.err (!%p344_p10)
}
  0x1b   :  { %s348_s1 = scalar_lea.vmem %s20_s8, 128  ;;  %p353_p12 = scmp.lt.s32.totalorder %s20_s8, %s20_s8 }
  0x1c   :  { %p349_p11 = scmp.ne.s32.totalorder %s20_s8, %s348_s1  ;;  %p354_p13 = scmp.lt.s32.totalorder %s348_s1, %s348_s1 }
  0x1e   :  { %p355_p0 = por %p354_p13, %p353_p12 }
  0x20   :  { %p356_p1 = pnand %p355_p0, %p349_p11 }
  0x22   :  { %359 = shalt.err (!%p356_p1)
}
  0x23   :  { %22 = dma.hbm_to_vmem [thread:$0]  %s512_s0, 128, %s20_s8, [#allocation3]  }
  0x24   :  { %s360_s22 = scalar_lea.hbm %s515_s3, 512 }
  0x25   :  { %p361_p2 = scmp.ne.s32.totalorder %s515_s3, %s360_s22  ;;  %p364_p3 = scmp.lt.u32.totalorder %s360_s22, %s515_s3 }
  0x27   :  { %p366_p4 = pnand %p364_p3, %p361_p2 }
  0x29   :  { %369 = shalt.err (!%p366_p4)
}
  0x2a   :  { %s370_s27 = scalar_lea.vmem %s43_s10, 512  ;;  %p375_p6 = scmp.lt.s32.totalorder %s43_s10, %s43_s10 }
  0x2b   :  { %p371_p5 = scmp.ne.s32.totalorder %s43_s10, %s370_s27  ;;  %p376_p7 = scmp.lt.s32.totalorder %s370_s27, %s370_s27 }
  0x2d   :  { %p377_p8 = por %p376_p7, %p375_p6 }
  0x2f   :  { %p378_p9 = pnand %p377_p8, %p371_p5 }
  0x31   :  { %381 = shalt.err (!%p378_p9)
}
  0x32   :  { %48 = dma.hbm_to_vmem [thread:$0]  %s515_s3, 512, %s43_s10, [#allocation6], %s411_s28, %s411_s28, %s412_s29  }
  0x33   :  { %404 = dma.done.wait [#allocation3], 128  }
  0x34   :  { %405 = vsyncadd [#allocation3], 4294967168 }
  0x35   :  { %406 = dma.done.wait [#allocation6], 1024  }
  0x36   :  { %407 = vsyncadd [#allocation6], 4294966272  ;;  %v415_v0 = vmov 0.0|0.0   ;;  %vm416_vm0 = vmmov 0   ;;  %v417_v1 = vmov 0.0   ;;  %v61_v2 = vld [vmem:[#allocation5] sm:$0xff] }
  0x37   :  { %291 = vmatprep.subr.bf16.mxu0 %v415_v0  ;;  %277 = vmatprep.mubr.msk.f32.mxu0 %vm416_vm0, %v417_v1  ;;  %v62_v3 = vld [vmem:[#allocation5 + $0x8] sm:$0xff]  ;;  %v63_v4 = vld [vmem:[#allocation5 + $0x10] sm:$0xff]  ;;  %v64_v6 = vld [vmem:[#allocation5 + $0x18] sm:$0xff]  ;;  %vm72_vm1 = vcmask 261120   ;;  %s418_s7 = smov [#allocation8]  }
  0x38   :  { %297 = vmatprep.subr.bf16.mxu1 %v415_v0  ;;  %288 = vmatprep.mubr.msk.f32.mxu1 %vm416_vm0, %v417_v1  ;;  %v292_v5 = vpack.c.bf16 %v62_v3, %v61_v2  ;;  %v295_v7 = vpack.c.bf16 %v64_v6, %v63_v4  ;;  %v60_v8 = vld [vmem:[#allocation2] sm:$0xff]  ;;  %v153_v9 = vld [vmem:[#allocation7] sm:$0xff]  ;;  %v154_v10 = vld [vmem:[#allocation7 + $0x8] sm:$0xff]  ;;  %s244_s8 = sshll.u32 %s418_s7, 4  ;;  %s245_s8 = int_to_ptr.vmem [resolvable:$true] %s244_s8 }
  0x39   :  { %v298_v11 = vpack.c.bf16 %v154_v10, %v153_v9  ;;  %v155_v12 = vld [vmem:[#allocation7 + $0x10] sm:$0xff]  ;;  %v156_v13 = vld [vmem:[#allocation7 + $0x18] sm:$0xff]  ;;  %p387_p11 = scmp.lt.s32.totalorder %s245_s8, %s245_s8 }
  0x3a   :  { %293 = vmatpush3.bf16.msra.mxu0 %v292_v5  ;;  %v301_v14 = vpack.c.bf16 %v156_v13, %v155_v12  ;;  %v254_v15 = vld [vmem:[%s514_s2] ss:$0 sm:$0xff]  ;;  %s382_s2 = scalar_lea.vmem %s245_s8, 128 }
  0x3b   :  { %294 = vmatprep.subr.bf16.mxu0 %v415_v0  ;;  %299 = vmatpush3.bf16.msra.mxu1 %v298_v11  ;;  %v257_v24 = vld [vmem:[%s516_s4] ss:$0 sm:$0xff]  ;;  %p383_p10 = scmp.ne.s32.totalorder %s245_s8, %s382_s2  ;;  %p388_p12 = scmp.lt.s32.totalorder %s382_s2, %s382_s2 }
  0x3c   :  { %300 = vmatprep.subr.bf16.mxu1 %v415_v0 }
  0x3d   :  { %p389_p13 = por %p388_p12, %p387_p11 }
  0x3e   :  { %296 = vmatpush3.bf16.msra.mxu0 %v295_v7 }
  0x3f   :  { %302 = vmatpush3.bf16.msra.mxu1 %v301_v14  ;;  %p390_p0 = pnand %p389_p13, %p383_p10 }
  0x41   :  { %278 = vmatmul.mubr.msk.f32.vlgmr.msra.gmra.mrb[0].mxu0 %vm72_vm1, %v60_v8 }
 0x114   :  { %v142_v16 = vpop.f32.mrb[0].mxu0 }
 0x115   :  { %v143_v17 = vadd.f32 %v254_v15, %v142_v16  ;;  %v279_v18 = vpop.f32.mrb[1].mxu0 }
 0x117   :  { %v256_v19 = vmul.f32 -1.442695, %v143_v17 }
 0x119   :  { %312 = vpow2.f32 %v256_v19 }
 0x123   :  { %v313_v20 = vpop.eup %312 }
 0x124   :  { %v149_v21 = vadd.f32 1.0, %v313_v20 }
 0x126   :  { %314 = vrcp.f32 %v149_v21 }
 0x130   :  { %v315_v22 = vpop.eup %314 }
 0x131   :  { %v152_v23 = vmul.f32 %v315_v22, %v143_v17 }
 0x133   :  { %289 = vmatmul.mubr.msk.f32.vlgmr.msra.gmra.mrb[0].mxu1 %vm72_vm1, %v152_v23 }
 0x206   :  { %v233_v25 = vpop.f32.mrb[0].mxu1 }
 0x207   :  { %v234_v26 = vadd.f32 %v257_v24, %v233_v25  ;;  %v290_v27 = vpop.f32.mrb[1].mxu1 }
 0x209   :  { %237 = vst.msk [vmem:[#allocation8] sm:$0xff] %vm72_vm1, %v234_v26 }
 0x20a   :  { %393 = shalt.err (!%p390_p0)
}
 0x20b   :  { %s394_s11 = scalar_lea.hbm %s517_s5, 128 }
 0x20c   :  { %p395_p1 = scmp.ne.s32.totalorder %s517_s5, %s394_s11  ;;  %p398_p2 = scmp.lt.u32.totalorder %s394_s11, %s517_s5 }
 0x20e   :  { %p400_p3 = pnand %p398_p2, %p395_p1 }
 0x210   :  { %403 = shalt.err (!%p400_p3)
}
 0x211   :  { %247 = dma.vmem_to_hbm [thread:$0]  %s245_s8, 128, %s517_s5, [#allocation4]  }
 0x212   :  { %408 = dma.done.wait [#allocation4], 128  }
 0x213   :  { %409 = vsyncadd [#allocation4], 4294967168 }
 0x214   :  { %251 = vsyncpa [#allocation3], 1 }
 0x215   :  { %252 = vsyncpa [#allocation6], 1 }
 0x216   :  { %253 = vsyncpa [#allocation4], 1 }

</bundles_post_ra>
